<compile_context>
chip_gen: v6e
topology: v6e:2x2x1
jax: 0.10.0
libtpu: 0.0.40
codegen_flags: <defaults>
</compile_context>

<pallas_src>
import jax
import jax.numpy as jnp
from jax import lax
from jax.experimental import pallas as pl
from jax.experimental.pallas import tpu as pltpu

LANES = 128
BLOCK_ROWS_MAX = 16384                    # 8 MiB f32 block upper cap
INPUT_VMEM_BUDGET = 24 * 1024 * 1024      # bytes for all double-buffered input tiles
VMEM_LIMIT_BYTES = 56 * 1024 * 1024       # > v5e/v6e scoped defaults, < v7x 64 MiB physical
MIN_PALLAS_ELEMS = 64 * LANES             # below this a Pallas launch is pure overhead


def _cdiv(a, b):
    return -(-a // b)


# ----------------------------- Pallas kernel -------------------------------

def _make_reduce_kernel(rows, block_rows, blocks_total, with_pair, num_regs):
    """Streaming sum-reduction kernel.

    Inputs : ([gt, pred] if with_pair) + num_regs regularizer streams,
             all (rows, 128) arrays tiled into (block_rows, 128) blocks.
    Outputs: ([sum|gt-pred|, sum (gt-pred)^2] if with_pair) + per-reg sums,
             each a lane-dense (8, 128) f32 partial (finished with jnp.sum
             outside the kernel).
    """
    groups = block_rows // 8
    ragged = (rows % block_rows) != 0
    n_in = (2 if with_pair else 0) + num_regs

    def kernel(*refs):
        in_refs = refs[:n_in]
        out_refs = refs[n_in:]
        j = pl.program_id(0)

        @pl.when(j == 0)
        def _init():
            for o in out_refs:
                o[...] = jnp.zeros(o.shape, jnp.float32)

        def fold(x):
            # (block_rows,128) -> (8,128): each 8-row group is exactly one f32
            # (8,128) tile, so the reshape is tile-aligned (no relayout) and
            # the axis-0 sum is pure VPU vreg-pair adds (no XLU, no big RMW).
            return x.reshape(groups, 8, LANES).sum(axis=0)

        def accumulate(mask_rows):
            valid = None
            if mask_rows:
                # Only the final (partial) block ever takes this path.
                row0 = j * block_rows
                row_ids = lax.broadcasted_iota(jnp.int32, (block_rows, LANES), 0)
                valid = (row_ids + row0) < rows
            base = 0
            if with_pair:
                d = (in_refs[0][...].astype(jnp.float32)
                     - in_refs[1][...].astype(jnp.float32))
                if mask_rows:
                    d = jnp.where(valid, d, 0.0)
                out_refs[0][...] += fold(jnp.abs(d))
                out_refs[1][...] += fold(d * d)
                base = 2
            for r in range(num_regs):
                x = in_refs[base + r][...].astype(jnp.float32)
                if mask_rows:
                    x = jnp.where(valid, x, 0.0)
                out_refs[base + r][...] += fold(x)

        if not ragged:
            accumulate(False)                      # no mask code traced at all
        elif blocks_total == 1:
            accumulate(True)
        else:
            @pl.when(j < blocks_total - 1)
            def _full_blocks():
                accumulate(False)

            @pl.when(j == blocks_total - 1)
            def _last_block():
                accumulate(True)

    return kernel


# ------------------------------ glue helpers -------------------------------

def _pick_block_rows(rows, n_streams, itemsize):
    """Largest multiple-of-8 row tile that keeps all double-buffered input
    tiles inside INPUT_VMEM_BUDGET (leaves ample room for elementwise temps
    under VMEM_LIMIT_BYTES on every TPU generation)."""
    per_buf = INPUT_VMEM_BUDGET // (2 * n_streams)
    br = per_buf // (LANES * itemsize)
    br = min(br, BLOCK_ROWS_MAX, rows)
    return max(8, (br // 8) * 8)


def _split_lanes(x):
    """Flatten to a lane-aligned (rows, 128) main part in the ORIGINAL dtype
    plus a <128-element flat tail (handled in plain jnp).  No jnp.pad copy.
    The reshape is free when numel % 128 == 0 (the common case)."""
    flat = x.reshape(-1)
    n = flat.shape[0]
    main_n = (n // LANES) * LANES
    if main_n == n:
        return flat.reshape(n // LANES, LANES), flat[:0]
    # TODO(synk): a 1-D ragged-tail block path would avoid XLA materializing
    # this prefix slice for non-multiple-of-128 element counts.
    return flat[:main_n].reshape(main_n // LANES, LANES), flat[main_n:]


def _pallas_reduce(pair, reg_mains):
    """Run one fused streaming-reduction pallas_call.

    `pair` is None or (gt_main, pred_main); `reg_mains` is a list of (rows,128)
    arrays with the same row count.  Returns the list of f32 scalar sums:
    [sum|gt-pred|, sum (gt-pred)^2] (if pair) + [sum r for r in reg_mains].
    """
    with_pair = pair is not None
    arrays = (list(pair) if with_pair else []) + list(reg_mains)
    rows = arrays[0].shape[0]
    n_streams = len(arrays)
    num_regs = len(reg_mains)
    n_io = (2 if with_pair else 0) + num_regs

    itemsize = max(a.dtype.itemsize for a in arrays)
    block_rows = _pick_block_rows(rows, n_streams, itemsize)
    blocks_total = _cdiv(rows, block_rows)

    elems = rows * LANES
    cost = pl.CostEstimate(
        flops=(6 * elems if with_pair else 0) + 2 * elems * num_regs,
        transcendentals=0,
        bytes_accessed=sum(a.size * a.dtype.itemsize for a in arrays))

    outs = pl.pallas_call(
        _make_reduce_kernel(rows, block_rows, blocks_total, with_pair, num_regs),
        out_shape=tuple(jax.ShapeDtypeStruct((8, LANES), jnp.float32)
                        for _ in range(n_io)),
        grid_spec=pltpu.PrefetchScalarGridSpec(
            num_scalar_prefetch=0,
            grid=(blocks_total,),
            in_specs=[pl.BlockSpec((block_rows, LANES), lambda j: (j, 0))
                      for _ in range(n_streams)],
            out_specs=[pl.BlockSpec((8, LANES), lambda j: (0, 0))
                       for _ in range(n_io)]),
        compiler_params=pltpu.CompilerParams(
            dimension_semantics=("arbitrary",),
            vmem_limit_bytes=VMEM_LIMIT_BYTES),
        cost_estimate=cost,
    )(*arrays)
    if not isinstance(outs, (list, tuple)):
        outs = (outs,)
    return [jnp.sum(o) for o in outs]


# ------------------------- ImageRegLoss forward -----------------------------

# Deterministic, in-script configuration (stands in for the ctor args).
LOSSES = {
    "l1Loss": ("l1", 1.0),    # mean(|gt - pred|) * 1.0
    "mseLoss": ("mse", 0.5),  # mean((gt - pred)^2) * 0.5
}
REG_HYPER_PARAMS = {
    "smoothReg": 0.1,
    "sparsityReg": 0.01,
}


def image_reg_loss(gt, pred, regs):
    """Mirrors ImageRegLoss.forward: returns dict of scalar losses."""
    n = gt.size
    reg_items = [(name, regs[name]) for name in REG_HYPER_PARAMS]

    if n >= MIN_PALLAS_ELEMS:
        gt_main, gt_tail = _split_lanes(gt)
        pred_main, pred_tail = _split_lanes(pred)
        rows = gt_main.shape[0]

        # Partition regularizers: fuse same-row-count ones into the pair
        # sweep; large mismatched ones get one standalone sum kernel each;
        # tiny ones go to plain jnp (launch overhead >> work).
        fused, standalone, tiny = [], [], []
        for name, r in reg_items:
            if r.size >= MIN_PALLAS_ELEMS:
                r_main, r_tail = _split_lanes(r)
                if r_main.shape[0] == rows:
                    fused.append((name, r_main, r_tail))
                else:
                    standalone.append((name, r_main, r_tail))
            else:
                tiny.append((name, r))

        sums = _pallas_reduce((gt_main, pred_main), [m for _, m, _ in fused])
        d_tail = gt_tail.astype(jnp.float32) - pred_tail.astype(jnp.float32)
        sad = sums[0] + jnp.sum(jnp.abs(d_tail))
        ssq = sums[1] + jnp.sum(d_tail * d_tail)

        reg_sums = {}
        for (name, _, r_tail), s in zip(fused, sums[2:]):
            reg_sums[name] = s + jnp.sum(r_tail.astype(jnp.float32))
        for name, r_main, r_tail in standalone:
            (s,) = _pallas_reduce(None, [r_main])
            reg_sums[name] = s + jnp.sum(r_tail.astype(jnp.float32))
        for name, r in tiny:
            reg_sums[name] = jnp.sum(r.astype(jnp.float32))
    else:
        # Sub-tile inputs: a Pallas launch is pure overhead, use fused XLA.
        d = gt.astype(jnp.float32) - pred.astype(jnp.float32)
        sad = jnp.sum(jnp.abs(d))
        ssq = jnp.sum(d * d)
        reg_sums = {name: jnp.sum(r.astype(jnp.float32)) for name, r in reg_items}

    per_pixel = {"l1": sad / n, "mse": ssq / n}

    ret = {}
    total_loss = jnp.float32(0.0)
    for loss_type, (kind, hyper_param) in LOSSES.items():
        loss = per_pixel[kind] * hyper_param
        total_loss = total_loss + loss
        ret[loss_type] = loss
    for reg_type, hyper_param in REG_HYPER_PARAMS.items():
        loss = (reg_sums[reg_type] / regs[reg_type].size) * hyper_param
        total_loss = total_loss + loss
        ret[reg_type] = loss
    ret["totalLoss"] = total_loss
    return ret


# ----------------------------------- main -----------------------------------

if __name__ == "__main__":
    def check(out, gt, pred, regs, rtol):
        d = gt.astype(jnp.float32) - pred.astype(jnp.float32)
        ref = {
            "l1Loss": jnp.mean(jnp.abs(d)) * 1.0,
            "mseLoss": jnp.mean(d * d) * 0.5,
            "smoothReg": jnp.mean(regs["smoothReg"].astype(jnp.float32)) * 0.1,
            "sparsityReg": jnp.mean(regs["sparsityReg"].astype(jnp.float32)) * 0.01,
        }
        ref["totalLoss"] = (ref["l1Loss"] + ref["mseLoss"]
                            + ref["smoothReg"] + ref["sparsityReg"])
        for k, v in ref.items():
            assert jnp.allclose(out[k], v, rtol=rtol, atol=1e-6), (k, out[k], v)

    key = jax.random.PRNGKey(0)
    k1, k2, k3, k4, k5, k6, k7, k8 = jax.random.split(key, 8)
    fn = jax.jit(image_reg_loss)

    # Small NCHW images: batch=2, channels=4, spatial=64x64 (single-block
    # fused path: gt, pred and smoothReg share one Pallas sweep; sparsityReg
    # is tiny -> jnp fallback).
    gt = jax.random.normal(k1, (2, 4, 64, 64), dtype=jnp.float32)
    pred = jax.random.normal(k2, (2, 4, 64, 64), dtype=jnp.float32)
    regs = {
        "smoothReg": jax.random.uniform(k3, (2, 4, 64, 64), dtype=jnp.float32),
        "sparsityReg": jax.random.uniform(k4, (2, 32), dtype=jnp.float32),
    }
    out = jax.block_until_ready(fn(gt, pred, regs))
    check(out, gt, pred, regs, rtol=1e-4)

    # Larger, lane-ragged image: exercises multi-block accumulation, the
    # masked (ragged) last block, the <128-element jnp tail, and the
    # standalone regularizer-sum kernel.
    gt2 = jax.random.normal(k5, (1, 1, 1237, 1301), dtype=jnp.float32)
    pred2 = jax.random.normal(k6, (1, 1, 1237, 1301), dtype=jnp.float32)
    regs2 = {
        "smoothReg": jax.random.uniform(k7, (1, 1, 1237, 1301), dtype=jnp.float32),
        "sparsityReg": jax.random.uniform(k8, (100, 130), dtype=jnp.float32),
    }
    out2 = jax.block_until_ready(fn(gt2, pred2, regs2))
    check(out2, gt2, pred2, regs2, rtol=2e-4)

    print("KERNEL_OK")
</pallas_src>

<mosaic_0001>
module attributes {stable_mosaic.version = 11 : i64} {
  func.func @kernel(%arg0: i32, %arg1: memref<256x128xf32, #tpu.memory_space<vmem>>, %arg2: memref<256x128xf32, #tpu.memory_space<vmem>>, %arg3: memref<256x128xf32, #tpu.memory_space<vmem>>, %arg4: memref<8x128xf32, #tpu.memory_space<vmem>>, %arg5: memref<8x128xf32, #tpu.memory_space<vmem>>, %arg6: memref<8x128xf32, #tpu.memory_space<vmem>>) attributes {dimension_semantics = [#tpu.dimension_semantics<arbitrary>], iteration_bounds = array<i64: 1>, scalar_prefetch = 0 : i64, scratch_operands = 0 : i64, tpu.core_type = #tpu.core_type<tc>, window_params = [{transform_indices = @transform_0, window_bounds = array<i64: 256, 128>}, {transform_indices = @transform_1, window_bounds = array<i64: 256, 128>}, {transform_indices = @transform_2, window_bounds = array<i64: 256, 128>}, {pipeline_mode = #tpu.pipeline_mode<synchronous>, transform_indices = @transform_3, window_bounds = array<i64: 8, 128>}, {pipeline_mode = #tpu.pipeline_mode<synchronous>, transform_indices = @transform_4, window_bounds = array<i64: 8, 128>}, {pipeline_mode = #tpu.pipeline_mode<synchronous>, transform_indices = @transform_5, window_bounds = array<i64: 8, 128>}]} {
    %c0_i32 = arith.constant 0 : i32
    %0 = arith.cmpi eq, %arg0, %c0_i32 : i32
    %1 = arith.extui %0 : i1 to i32
    %c0_i32_0 = arith.constant 0 : i32
    %2 = arith.cmpi ne, %1, %c0_i32_0 : i32
    scf.if %2 {
      %cst_20 = arith.constant 0.000000e+00 : f32
      %24 = vector.broadcast %cst_20 : f32 to vector<8x128xf32>
      %c0_21 = arith.constant 0 : index
      %c0_22 = arith.constant 0 : index
      %25 = vector.load %arg4[%c0_21, %c0_22] : memref<8x128xf32, #tpu.memory_space<vmem>>, vector<8x128xf32>
      tpu.vector_store %arg4[%c0_21, %c0_22], %24 {strides = array<i32>} : memref<8x128xf32, #tpu.memory_space<vmem>>, vector<8x128xf32>,
      %cst_23 = arith.constant 0.000000e+00 : f32
      %26 = vector.broadcast %cst_23 : f32 to vector<8x128xf32>
      %c0_24 = arith.constant 0 : index
      %c0_25 = arith.constant 0 : index
      %27 = vector.load %arg5[%c0_24, %c0_25] : memref<8x128xf32, #tpu.memory_space<vmem>>, vector<8x128xf32>
      tpu.vector_store %arg5[%c0_24, %c0_25], %26 {strides = array<i32>} : memref<8x128xf32, #tpu.memory_space<vmem>>, vector<8x128xf32>,
      %cst_26 = arith.constant 0.000000e+00 : f32
      %28 = vector.broadcast %cst_26 : f32 to vector<8x128xf32>
      %c0_27 = arith.constant 0 : index
      %c0_28 = arith.constant 0 : index
      %29 = vector.load %arg6[%c0_27, %c0_28] : memref<8x128xf32, #tpu.memory_space<vmem>>, vector<8x128xf32>
      tpu.vector_store %arg6[%c0_27, %c0_28], %28 {strides = array<i32>} : memref<8x128xf32, #tpu.memory_space<vmem>>, vector<8x128xf32>,
    } else {
    }
    %c0 = arith.constant 0 : index
    %c0_1 = arith.constant 0 : index
    %3 = vector.load %arg1[%c0, %c0_1] : memref<256x128xf32, #tpu.memory_space<vmem>>, vector<256x128xf32>
    %c0_2 = arith.constant 0 : index
    %c0_3 = arith.constant 0 : index
    %4 = vector.load %arg2[%c0_2, %c0_3] : memref<256x128xf32, #tpu.memory_space<vmem>>, vector<256x128xf32>
    %5 = arith.subf %3, %4 : vector<256x128xf32>
    %c0_4 = arith.constant 0 : index
    %c0_5 = arith.constant 0 : index
    %6 = vector.load %arg4[%c0_4, %c0_5] : memref<8x128xf32, #tpu.memory_space<vmem>>, vector<8x128xf32>
    %7 = math.absf %5 : vector<256x128xf32>
    %8 = vector.shape_cast %7 : vector<256x128xf32> to vector<32x8x128xf32>
    %cst = arith.constant dense<0.000000e+00> : vector<8x128xf32>
    %9 = vector.multi_reduction <add>, %8, %cst [0] : vector<32x8x128xf32> to vector<8x128xf32>
    %10 = arith.addf %6, %9 : vector<8x128xf32>
    %c0_6 = arith.constant 0 : index
    %c0_7 = arith.constant 0 : index
    %11 = vector.load %arg4[%c0_6, %c0_7] : memref<8x128xf32, #tpu.memory_space<vmem>>, vector<8x128xf32>
    tpu.vector_store %arg4[%c0_6, %c0_7], %10 {strides = array<i32>} : memref<8x128xf32, #tpu.memory_space<vmem>>, vector<8x128xf32>,
    %c0_8 = arith.constant 0 : index
    %c0_9 = arith.constant 0 : index
    %12 = vector.load %arg5[%c0_8, %c0_9] : memref<8x128xf32, #tpu.memory_space<vmem>>, vector<8x128xf32>
    %13 = arith.mulf %5, %5 : vector<256x128xf32>
    %14 = vector.shape_cast %13 : vector<256x128xf32> to vector<32x8x128xf32>
    %cst_10 = arith.constant dense<0.000000e+00> : vector<8x128xf32>
    %15 = vector.multi_reduction <add>, %14, %cst_10 [0] : vector<32x8x128xf32> to vector<8x128xf32>
    %16 = arith.addf %12, %15 : vector<8x128xf32>
    %c0_11 = arith.constant 0 : index
    %c0_12 = arith.constant 0 : index
    %17 = vector.load %arg5[%c0_11, %c0_12] : memref<8x128xf32, #tpu.memory_space<vmem>>, vector<8x128xf32>
    tpu.vector_store %arg5[%c0_11, %c0_12], %16 {strides = array<i32>} : memref<8x128xf32, #tpu.memory_space<vmem>>, vector<8x128xf32>,
    %c0_13 = arith.constant 0 : index
    %c0_14 = arith.constant 0 : index
    %18 = vector.load %arg3[%c0_13, %c0_14] : memref<256x128xf32, #tpu.memory_space<vmem>>, vector<256x128xf32>
    %c0_15 = arith.constant 0 : index
    %c0_16 = arith.constant 0 : index
    %19 = vector.load %arg6[%c0_15, %c0_16] : memref<8x128xf32, #tpu.memory_space<vmem>>, vector<8x128xf32>
    %20 = vector.shape_cast %18 : vector<256x128xf32> to vector<32x8x128xf32>
    %cst_17 = arith.constant dense<0.000000e+00> : vector<8x128xf32>
    %21 = vector.multi_reduction <add>, %20, %cst_17 [0] : vector<32x8x128xf32> to vector<8x128xf32>
    %22 = arith.addf %19, %21 : vector<8x128xf32>
    %c0_18 = arith.constant 0 : index
    %c0_19 = arith.constant 0 : index
    %23 = vector.load %arg6[%c0_18, %c0_19] : memref<8x128xf32, #tpu.memory_space<vmem>>, vector<8x128xf32>
    tpu.vector_store %arg6[%c0_18, %c0_19], %22 {strides = array<i32>} : memref<8x128xf32, #tpu.memory_space<vmem>>, vector<8x128xf32>,
    return
  }
  func.func @transform_0(%arg0: i32) -> (i32, i32) {
    %c0_i32 = arith.constant 0 : i32
    %c0_i32_0 = arith.constant 0 : i32
    return %arg0, %c0_i32 : i32, i32
  }
  func.func @transform_1(%arg0: i32) -> (i32, i32) {
    %c0_i32 = arith.constant 0 : i32
    %c0_i32_0 = arith.constant 0 : i32
    return %arg0, %c0_i32 : i32, i32
  }
  func.func @transform_2(%arg0: i32) -> (i32, i32) {
    %c0_i32 = arith.constant 0 : i32
    %c0_i32_0 = arith.constant 0 : i32
    return %arg0, %c0_i32 : i32, i32
  }
  func.func @transform_3(%arg0: i32) -> (i32, i32) {
    %c0_i32 = arith.constant 0 : i32
    %c0_i32_0 = arith.constant 0 : i32
    %c0_i32_1 = arith.constant 0 : i32
    return %c0_i32, %c0_i32_0 : i32, i32
  }
  func.func @transform_4(%arg0: i32) -> (i32, i32) {
    %c0_i32 = arith.constant 0 : i32
    %c0_i32_0 = arith.constant 0 : i32
    %c0_i32_1 = arith.constant 0 : i32
    return %c0_i32, %c0_i32_0 : i32, i32
  }
  func.func @transform_5(%arg0: i32) -> (i32, i32) {
    %c0_i32 = arith.constant 0 : i32
    %c0_i32_0 = arith.constant 0 : i32
    %c0_i32_1 = arith.constant 0 : i32
    return %c0_i32, %c0_i32_0 : i32, i32
  }
}

</mosaic_0001>

<bundles_post_ra>
// kernel: image_reg_loss.1
= control target key start
LH: loop header
LB: loop body
LE: loop exit
PB: predicated region body
PF: predicated region fallthrough
CT: control target
= control target key end

     0   :  { %s773_s0 = inlined_call_operand.vmem [shape: f32[256,128], index: 0, kind: input, shape index: {}]   ;;  %s774_s1 = inlined_call_operand.vmem [shape: f32[256,128], index: 1, kind: input, shape index: {}]   ;;  %s775_s2 = inlined_call_operand.vmem [shape: f32[256,128], index: 2, kind: input, shape index: {}]   ;;  %s776_s3 = inlined_call_operand.vmem [shape: f32[8,128], index: 3, kind: output, shape index: {0}]   ;;  %s777_s4 = inlined_call_operand.vmem [shape: f32[8,128], index: 4, kind: output, shape index: {1}]   ;;  %s778_s5 = inlined_call_operand.vmem [shape: f32[8,128], index: 5, kind: output, shape index: {2}]  }
   0x1   :  { %v24_v0 = vld [vmem:[%s773_s0] sm:$0xff]  ;;  %v25_v1 = vld [vmem:[%s773_s0 + $0x8] sm:$0xff]  ;;  %v26_v4 = vld [vmem:[%s773_s0 + $0x10] sm:$0xff] }
   0x2   :  { %v56_v2 = vld [vmem:[%s774_s1] sm:$0xff]  ;;  %v57_v3 = vld [vmem:[%s774_s1 + $0x8] sm:$0xff]  ;;  %v58_v5 = vld [vmem:[%s774_s1 + $0x10] sm:$0xff] }
   0x3   :  { %v88_v6 = vsub.f32 %v24_v0, %v56_v2  ;;  %v89_v7 = vsub.f32 %v25_v1, %v57_v3  ;;  %v27_v8 = vld [vmem:[%s773_s0 + $0x18] sm:$0xff]  ;;  %v90_v10 = vsub.f32 %v26_v4, %v58_v5  ;;  %v28_v11 = vld [vmem:[%s773_s0 + $0x20] sm:$0xff]  ;;  %v29_v16 = vld [vmem:[%s773_s0 + $0x28] sm:$0xff] }
   0x4   :  { %v59_v9 = vld [vmem:[%s774_s1 + $0x18] sm:$0xff]  ;;  %v60_v12 = vld [vmem:[%s774_s1 + $0x20] sm:$0xff]  ;;  %v61_v17 = vld [vmem:[%s774_s1 + $0x28] sm:$0xff] }
   0x5   :  { %v91_v13 = vsub.f32 %v27_v8, %v59_v9  ;;  %v121_v14 = vand.u32 2147483647, %v88_v6  ;;  %v122_v15 = vand.u32 2147483647, %v89_v7  ;;  %v92_v18 = vsub.f32 %v28_v11, %v60_v12  ;;  %v30_v20 = vld [vmem:[%s773_s0 + $0x30] sm:$0xff]  ;;  %v31_v25 = vld [vmem:[%s773_s0 + $0x38] sm:$0xff] }
   0x6   :  { %v123_v19 = vand.u32 2147483647, %v90_v10  ;;  %v62_v21 = vld [vmem:[%s774_s1 + $0x30] sm:$0xff]  ;;  %v403_v22 = vsub.f32 %v29_v16, %v61_v17  ;;  %v63_v26 = vld [vmem:[%s774_s1 + $0x38] sm:$0xff]  ;;  %v32_v30 = vld [vmem:[%s773_s0 + $0x40] sm:$0xff]  ;;  %v187_v52 = vmul.f32 %v88_v6, %v88_v6  ;;  %v188_v53 = vmul.f32 %v89_v7, %v89_v7 }
   0x7   :  { %v124_v23 = vand.u32 2147483647, %v91_v13  ;;  %v153_v24 = vadd.f32 %v122_v15, %v121_v14  ;;  %v411_v27 = vsub.f32 %v30_v20, %v62_v21  ;;  %v125_v28 = vand.u32 2147483647, %v92_v18  ;;  %v64_v31 = vld [vmem:[%s774_s1 + $0x40] sm:$0xff]  ;;  %v33_v35 = vld [vmem:[%s773_s0 + $0x48] sm:$0xff] }
   0x8   :  { %v419_v32 = vsub.f32 %v31_v25, %v63_v26  ;;  %v126_v33 = vand.u32 2147483647, %v403_v22  ;;  %v65_v36 = vld [vmem:[%s774_s1 + $0x48] sm:$0xff]  ;;  %v428_v37 = vsub.f32 %v32_v30, %v64_v31  ;;  %v34_v40 = vld [vmem:[%s773_s0 + $0x50] sm:$0xff]  ;;  %v35_v45 = vld [vmem:[%s773_s0 + $0x58] sm:$0xff]  ;;  %v189_v61 = vmul.f32 %v90_v10, %v90_v10 }
   0x9   :  { %v154_v29 = vadd.f32 %v153_v24, %v123_v19  ;;  %v127_v38 = vand.u32 2147483647, %v411_v27  ;;  %v66_v41 = vld [vmem:[%s774_s1 + $0x50] sm:$0xff]  ;;  %v437_v42 = vsub.f32 %v33_v35, %v65_v36  ;;  %v67_v46 = vld [vmem:[%s774_s1 + $0x58] sm:$0xff]  ;;  %v36_v50 = vld [vmem:[%s773_s0 + $0x60] sm:$0xff]  ;;  %v190_v4 = vmul.f32 %v91_v13, %v91_v13 }
   0xa   :  { %v128_v43 = vand.u32 2147483647, %v419_v32  ;;  %v446_v47 = vsub.f32 %v34_v40, %v66_v41  ;;  %v129_v48 = vand.u32 2147483647, %v428_v37  ;;  %v68_v51 = vld [vmem:[%s774_s1 + $0x60] sm:$0xff]  ;;  %v455_v54 = vsub.f32 %v35_v45, %v67_v46  ;;  %v253_v58 = vld [vmem:[%s775_s2 + $0x8] sm:$0xff] }
   0xb   :  { %v155_v34 = vadd.f32 %v154_v29, %v124_v23  ;;  %v130_v55 = vand.u32 2147483647, %v437_v42  ;;  %v252_v57 = vld [vmem:[%s775_s2] sm:$0xff]  ;;  %v37_v59 = vld [vmem:[%s773_s0 + $0x68] sm:$0xff]  ;;  %v470_v62 = vsub.f32 %v36_v50, %v68_v51  ;;  %v254_v1 = vld [vmem:[%s775_s2 + $0x10] sm:$0xff]  ;;  %v219_v5 = vadd.f32 %v188_v53, %v187_v52 }
   0xc   :  { %v69_v60 = vld [vmem:[%s774_s1 + $0x68] sm:$0xff]  ;;  %v131_v63 = vand.u32 2147483647, %v446_v47  ;;  %v38_v2 = vld [vmem:[%s773_s0 + $0x70] sm:$0xff]  ;;  %v285_v6 = vadd.f32 %v253_v58, %v252_v57  ;;  %v132_v8 = vand.u32 2147483647, %v455_v54  ;;  %v191_v13 = vmul.f32 %v92_v18, %v92_v18 }
   0xd   :  { %v156_v39 = vadd.f32 %v155_v34, %v125_v28  ;;  %v70_v3 = vld [vmem:[%s774_s1 + $0x70] sm:$0xff]  ;;  %v482_v7 = vsub.f32 %v37_v59, %v69_v60  ;;  %v255_v10 = vld [vmem:[%s775_s2 + $0x18] sm:$0xff]  ;;  %v220_v14 = vadd.f32 %v219_v5, %v189_v61  ;;  %v133_v17 = vand.u32 2147483647, %v470_v62  ;;  %v256_v20 = vld [vmem:[%s775_s2 + $0x20] sm:$0xff] }
   0xe   :  { %v39_v11 = vld [vmem:[%s773_s0 + $0x78] sm:$0xff]  ;;  %v286_v15 = vadd.f32 %v285_v6, %v254_v1  ;;  %v494_v16 = vsub.f32 %v38_v2, %v70_v3  ;;  %v40_v21 = vld [vmem:[%s773_s0 + $0x80] sm:$0xff]  ;;  %v192_v18 = vmul.f32 %v403_v22, %v403_v22  ;;  %v257_v30 = vld [vmem:[%s775_s2 + $0x28] sm:$0xff]  ;;  %v193_v22 = vmul.f32 %v411_v27, %v411_v27 }
   0xf   :  { %v157_v44 = vadd.f32 %v156_v39, %v126_v33  ;;  %v71_v12 = vld [vmem:[%s774_s1 + $0x78] sm:$0xff]  ;;  %v72_v23 = vld [vmem:[%s774_s1 + $0x80] sm:$0xff]  ;;  %v221_v24 = vadd.f32 %v220_v14, %v190_v4  ;;  %v134_v28 = vand.u32 2147483647, %v482_v7  ;;  %v41_v31 = vld [vmem:[%s773_s0 + $0x88] sm:$0xff]  ;;  %v194_v27 = vmul.f32 %v419_v32, %v419_v32 }
  0x10   :  { %v287_v25 = vadd.f32 %v286_v15, %v255_v10  ;;  %v508_v26 = vsub.f32 %v39_v11, %v71_v12  ;;  %v73_v33 = vld [vmem:[%s774_s1 + $0x88] sm:$0xff]  ;;  %v522_v36 = vsub.f32 %v40_v21, %v72_v23  ;;  %v258_v40 = vld [vmem:[%s775_s2 + $0x30] sm:$0xff]  ;;  %v259_v50 = vld [vmem:[%s775_s2 + $0x38] sm:$0xff]  ;;  %v195_v32 = vmul.f32 %v428_v37, %v428_v37 }
  0x11   :  { %v158_v49 = vadd.f32 %v157_v44, %v127_v38  ;;  %v222_v34 = vadd.f32 %v221_v24, %v191_v13  ;;  %v135_v38 = vand.u32 2147483647, %v494_v16  ;;  %v42_v41 = vld [vmem:[%s773_s0 + $0x90] sm:$0xff]  ;;  %v536_v46 = vsub.f32 %v41_v31, %v73_v33  ;;  %v43_v51 = vld [vmem:[%s773_s0 + $0x98] sm:$0xff]  ;;  %v260_v59 = vld [vmem:[%s775_s2 + $0x40] sm:$0xff] }
  0x12   :  { %v288_v35 = vadd.f32 %v287_v25, %v256_v20  ;;  %v75_v52 = vld [vmem:[%s774_s1 + $0x98] sm:$0xff]  ;;  %v137_v57 = vand.u32 2147483647, %v522_v36  ;;  %v44_v60 = vld [vmem:[%s773_s0 + $0xa0] sm:$0xff]  ;;  %v196_v37 = vmul.f32 %v437_v42, %v437_v42  ;;  %v261_v4 = vld [vmem:[%s775_s2 + $0x48] sm:$0xff]  ;;  %v197_v42 = vmul.f32 %v446_v47, %v446_v47 }
  0x13   :  { %v159_v56 = vadd.f32 %v158_v49, %v128_v43  ;;  %v74_v43 = vld [vmem:[%s774_s1 + $0x90] sm:$0xff]  ;;  %v223_v44 = vadd.f32 %v222_v34, %v192_v18  ;;  %v76_v61 = vld [vmem:[%s774_s1 + $0xa0] sm:$0xff]  ;;  %v564_v1 = vsub.f32 %v43_v51, %v75_v52  ;;  %v138_v2 = vand.u32 2147483647, %v536_v46  ;;  %v45_v5 = vld [vmem:[%s773_s0 + $0xa8] sm:$0xff] }
  0x14   :  { %v289_v45 = vadd.f32 %v288_v35, %v257_v30  ;;  %v77_v6 = vld [vmem:[%s774_s1 + $0xa8] sm:$0xff]  ;;  %v578_v10 = vsub.f32 %v44_v60, %v76_v61  ;;  %v262_v13 = vld [vmem:[%s775_s2 + $0x50] sm:$0xff]  ;;  %v198_v47 = vmul.f32 %v455_v54, %v455_v54  ;;  %v263_v18 = vld [vmem:[%s775_s2 + $0x58] sm:$0xff]  ;;  %v199_v54 = vmul.f32 %v470_v62, %v470_v62 }
  0x15   :  { %v160_v0 = vadd.f32 %v159_v56, %v129_v48  ;;  %v136_v48 = vand.u32 2147483647, %v508_v26  ;;  %v224_v53 = vadd.f32 %v223_v44, %v193_v22  ;;  %v550_v56 = vsub.f32 %v42_v41, %v74_v43  ;;  %v46_v14 = vld [vmem:[%s773_s0 + $0xb0] sm:$0xff]  ;;  %v47_v24 = vld [vmem:[%s773_s0 + $0xb8] sm:$0xff]  ;;  %v264_v22 = vld [vmem:[%s775_s2 + $0x60] sm:$0xff] }
  0x16   :  { %v78_v15 = vld [vmem:[%s774_s1 + $0xb0] sm:$0xff]  ;;  %v592_v20 = vsub.f32 %v45_v5, %v77_v6  ;;  %v140_v21 = vand.u32 2147483647, %v564_v1  ;;  %v79_v25 = vld [vmem:[%s774_s1 + $0xb8] sm:$0xff]  ;;  %v141_v31 = vand.u32 2147483647, %v578_v10  ;;  %v200_v62 = vmul.f32 %v482_v7, %v482_v7 }
  0x17   :  { %v161_v9 = vadd.f32 %v160_v0, %v130_v55  ;;  %v290_v55 = vadd.f32 %v289_v45, %v258_v40  ;;  %v139_v11 = vand.u32 2147483647, %v550_v56  ;;  %v606_v30 = vsub.f32 %v46_v14, %v78_v15  ;;  %v48_v34 = vld [vmem:[%s773_s0 + $0xc0] sm:$0xff]  ;;  %v49_v44 = vld [vmem:[%s773_s0 + $0xc8] sm:$0xff] }
  0x18   :  { %v80_v35 = vld [vmem:[%s774_s1 + $0xc0] sm:$0xff]  ;;  %v620_v40 = vsub.f32 %v47_v24, %v79_v25  ;;  %v142_v41 = vand.u32 2147483647, %v592_v20  ;;  %v81_v45 = vld [vmem:[%s774_s1 + $0xc8] sm:$0xff]  ;;  %v201_v7 = vmul.f32 %v494_v16, %v494_v16  ;;  %v202_v16 = vmul.f32 %v508_v26, %v508_v26 }
  0x19   :  { %v162_v19 = vadd.f32 %v161_v9, %v131_v63  ;;  %v225_v63 = vadd.f32 %v224_v53, %v194_v27  ;;  %v291_v0 = vadd.f32 %v290_v55, %v259_v50  ;;  %v265_v27 = vld [vmem:[%s775_s2 + $0x68] sm:$0xff]  ;;  %v634_v50 = vsub.f32 %v48_v34, %v80_v35  ;;  %v50_v53 = vld [vmem:[%s773_s0 + $0xd0] sm:$0xff] }
  0x1a   :  { %v143_v51 = vand.u32 2147483647, %v606_v30  ;;  %v82_v55 = vld [vmem:[%s774_s1 + $0xd0] sm:$0xff]  ;;  %v144_v60 = vand.u32 2147483647, %v620_v40  ;;  %v203_v26 = vmul.f32 %v522_v36, %v522_v36  ;;  %v204_v36 = vmul.f32 %v536_v46, %v536_v46 }
  0x1b   :  { %v163_v29 = vadd.f32 %v162_v19, %v132_v8  ;;  %v226_v8 = vadd.f32 %v225_v63, %v195_v32  ;;  %v292_v9 = vadd.f32 %v291_v0, %v260_v59  ;;  %v266_v32 = vld [vmem:[%s775_s2 + $0x70] sm:$0xff]  ;;  %v648_v59 = vsub.f32 %v49_v44, %v81_v45  ;;  %v51_v63 = vld [vmem:[%s773_s0 + $0xd8] sm:$0xff] }
  0x1c   :  { %v83_v0 = vld [vmem:[%s774_s1 + $0xd8] sm:$0xff]  ;;  %v145_v5 = vand.u32 2147483647, %v634_v50  ;;  %v205_v46 = vmul.f32 %v550_v56, %v550_v56  ;;  %v206_v56 = vmul.f32 %v564_v1, %v564_v1  ;;  %v207_v1 = vmul.f32 %v578_v10, %v578_v10  ;;  %v273_v10 = vld [vmem:[%s775_s2 + $0xa8] sm:$0xff] }
  0x1d   :  { %v164_v39 = vadd.f32 %v163_v29, %v133_v17  ;;  %v227_v17 = vadd.f32 %v226_v8, %v196_v37  ;;  %v293_v19 = vadd.f32 %v292_v9, %v261_v4  ;;  %v267_v37 = vld [vmem:[%s775_s2 + $0x78] sm:$0xff]  ;;  %v662_v4 = vsub.f32 %v50_v53, %v82_v55  ;;  %v52_v8 = vld [vmem:[%s773_s0 + $0xe0] sm:$0xff] }
  0x1e   :  { %v84_v9 = vld [vmem:[%s774_s1 + $0xe0] sm:$0xff]  ;;  %v146_v14 = vand.u32 2147483647, %v648_v59  ;;  %v209_v55 = vmul.f32 %v606_v30, %v606_v30  ;;  %v211_v30 = vmul.f32 %v634_v50, %v634_v50 }
  0x1f   :  { %v165_v49 = vadd.f32 %v164_v39, %v134_v28  ;;  %v228_v28 = vadd.f32 %v227_v17, %v197_v42  ;;  %v294_v29 = vadd.f32 %v293_v19, %v262_v13  ;;  %v268_v42 = vld [vmem:[%s775_s2 + $0x80] sm:$0xff]  ;;  %v676_v13 = vsub.f32 %v51_v63, %v83_v0  ;;  %v53_v17 = vld [vmem:[%s773_s0 + $0xe8] sm:$0xff] }
  0x20   :  { %v85_v19 = vld [vmem:[%s774_s1 + $0xe8] sm:$0xff]  ;;  %v147_v24 = vand.u32 2147483647, %v662_v4  ;;  %v213_v50 = vmul.f32 %v662_v4, %v662_v4 }
  0x21   :  { %v166_v58 = vadd.f32 %v165_v49, %v135_v38  ;;  %v229_v38 = vadd.f32 %v228_v28, %v198_v47  ;;  %v295_v39 = vadd.f32 %v294_v29, %v263_v18  ;;  %v269_v47 = vld [vmem:[%s775_s2 + $0x88] sm:$0xff]  ;;  %v116_v18 = vsub.f32 %v52_v8, %v84_v9  ;;  %v54_v28 = vld [vmem:[%s773_s0 + $0xf0] sm:$0xff] }
  0x22   :  { %v86_v29 = vld [vmem:[%s774_s1 + $0xf0] sm:$0xff]  ;;  %v148_v34 = vand.u32 2147483647, %v676_v13 }
  0x23   :  { %v167_v3 = vadd.f32 %v166_v58, %v136_v48  ;;  %v230_v48 = vadd.f32 %v229_v38, %v199_v54  ;;  %v296_v49 = vadd.f32 %v295_v39, %v264_v22  ;;  %v270_v54 = vld [vmem:[%s775_s2 + $0x90] sm:$0xff]  ;;  %v117_v22 = vsub.f32 %v53_v17, %v85_v19  ;;  %v55_v38 = vld [vmem:[%s773_s0 + $0xf8] sm:$0xff] }
  0x24   :  { %v87_v39 = vld [vmem:[%s774_s1 + $0xf8] sm:$0xff]  ;;  %v149_v44 = vand.u32 2147483647, %v116_v18  ;;  %v215_v4 = vmul.f32 %v116_v18, %v116_v18  ;;  %v282_v18 = vld [vmem:[%s775_s2 + $0xf0] sm:$0xff] }
  0x25   :  { %v168_v12 = vadd.f32 %v167_v3, %v137_v57  ;;  %v231_v57 = vadd.f32 %v230_v48, %v200_v62  ;;  %v297_v58 = vadd.f32 %v296_v49, %v265_v27  ;;  %v271_v62 = vld [vmem:[%s775_s2 + $0x98] sm:$0xff]  ;;  %v118_v27 = vsub.f32 %v54_v28, %v86_v29 }
  0x26   :  { %v208_v48 = vmul.f32 %v592_v20, %v592_v20  ;;  %v274_v20 = vld [vmem:[%s775_s2 + $0xb0] sm:$0xff]  ;;  %v279_v19 = vld [vmem:[%s775_s2 + $0xd8] sm:$0xff] }
  0x27   :  { %v169_v23 = vadd.f32 %v168_v12, %v138_v2  ;;  %v232_v2 = vadd.f32 %v231_v57, %v201_v7  ;;  %v298_v3 = vadd.f32 %v297_v58, %v266_v32  ;;  %v272_v7 = vld [vmem:[%s775_s2 + $0xa0] sm:$0xff]  ;;  %v150_v32 = vand.u32 2147483647, %v117_v22 }
  0x28   :  { %v151_v58 = vand.u32 2147483647, %v118_v27  ;;  %v217_v28 = vmul.f32 %v118_v27, %v118_v27 }
  0x29   :  { %v170_v33 = vadd.f32 %v169_v23, %v139_v11  ;;  %v233_v11 = vadd.f32 %v232_v2, %v202_v16  ;;  %v299_v12 = vadd.f32 %v298_v3, %v267_v37  ;;  %v275_v2 = vld [vmem:[%s775_s2 + $0xb8] sm:$0xff] }
  0x2b   :  { %v171_v43 = vadd.f32 %v170_v33, %v140_v21  ;;  %v234_v21 = vadd.f32 %v233_v11, %v203_v26  ;;  %v300_v23 = vadd.f32 %v299_v12, %v268_v42  ;;  %v276_v42 = vld [vmem:[%s775_s2 + $0xc0] sm:$0xff]  ;;  %v277_v11 = vld [vmem:[%s775_s2 + $0xc8] sm:$0xff] }
  0x2d   :  { %v172_v52 = vadd.f32 %v171_v43, %v141_v31  ;;  %v235_v31 = vadd.f32 %v234_v21, %v204_v36  ;;  %v301_v33 = vadd.f32 %v300_v23, %v269_v47  ;;  %v214_v47 = vmul.f32 %v676_v13, %v676_v13  ;;  %v280_v23 = vld [vmem:[%s775_s2 + $0xe0] sm:$0xff] }
  0x2f   :  { %v173_v61 = vadd.f32 %v172_v52, %v142_v41  ;;  %v236_v41 = vadd.f32 %v235_v31, %v205_v46  ;;  %v302_v43 = vadd.f32 %v301_v33, %v270_v54  ;;  %v119_v52 = vsub.f32 %v55_v38, %v87_v39  ;;  %v281_v54 = vld [vmem:[%s775_s2 + $0xe8] sm:$0xff] }
  0x31   :  { %v174_v6 = vadd.f32 %v173_v61, %v143_v51  ;;  %v237_v49 = vadd.f32 %v236_v41, %v206_v56  ;;  %v303_v51 = vadd.f32 %v302_v43, %v271_v62  ;;  %v210_v61 = vmul.f32 %v620_v40, %v620_v40 }
  0x32   :  { %v152_v0 = vand.u32 2147483647, %v119_v52  ;;  %v212_v40 = vmul.f32 %v648_v59, %v648_v59  ;;  %v218_v31 = vmul.f32 %v119_v52, %v119_v52 }
  0x33   :  { %v175_v15 = vadd.f32 %v174_v6, %v144_v60  ;;  %v238_v16 = vadd.f32 %v237_v49, %v207_v1  ;;  %v304_v57 = vadd.f32 %v303_v51, %v272_v7 }
  0x35   :  { %v176_v25 = vadd.f32 %v175_v15, %v145_v5  ;;  %v239_v37 = vadd.f32 %v238_v16, %v208_v48  ;;  %v305_v63 = vadd.f32 %v304_v57, %v273_v10  ;;  %v278_v15 = vld [vmem:[%s775_s2 + $0xd0] sm:$0xff] }
  0x37   :  { %v177_v35 = vadd.f32 %v176_v25, %v146_v14  ;;  %v240_v3 = vadd.f32 %v239_v37, %v209_v55  ;;  %v306_v5 = vadd.f32 %v305_v63, %v274_v20 }
  0x39   :  { %v178_v45 = vadd.f32 %v177_v35, %v147_v24  ;;  %v241_v8 = vadd.f32 %v240_v3, %v210_v61  ;;  %v307_v9 = vadd.f32 %v306_v5, %v275_v2  ;;  %v216_v24 = vmul.f32 %v117_v22, %v117_v22  ;;  %v283_v22 = vld [vmem:[%s775_s2 + $0xf8] sm:$0xff] }
  0x3b   :  { %v179_v53 = vadd.f32 %v178_v45, %v148_v34  ;;  %v242_v12 = vadd.f32 %v241_v8, %v211_v30  ;;  %v308_v14 = vadd.f32 %v307_v9, %v276_v42 }
  0x3d   :  { %v180_v60 = vadd.f32 %v179_v53, %v149_v44  ;;  %v243_v59 = vadd.f32 %v242_v12, %v212_v40  ;;  %v309_v17 = vadd.f32 %v308_v14, %v277_v11 }
  0x3f   :  { %v181_v26 = vadd.f32 %v180_v60, %v150_v32  ;;  %v244_v46 = vadd.f32 %v243_v59, %v213_v50  ;;  %v310_v21 = vadd.f32 %v309_v17, %v278_v15 }
  0x41   :  { %v182_v6 = vadd.f32 %v181_v26, %v151_v58  ;;  %v245_v25 = vadd.f32 %v244_v46, %v214_v47  ;;  %v311_v13 = vadd.f32 %v310_v21, %v279_v19 }
  0x43   :  { %v183_v36 = vadd.f32 %v182_v6, %v152_v0  ;;  %v246_v29 = vadd.f32 %v245_v25, %v215_v4  ;;  %v312_v56 = vadd.f32 %v311_v13, %v280_v23 }
  0x45   :  { %185 = vst [vmem:[%s776_s3] sm:$0xff] %v183_v36  ;;  %v247_v33 = vadd.f32 %v246_v29, %v216_v24  ;;  %v313_v34 = vadd.f32 %v312_v56, %v281_v54 }
  0x47   :  { %v248_v35 = vadd.f32 %v247_v33, %v217_v28  ;;  %v314_v62 = vadd.f32 %v313_v34, %v282_v18 }
  0x49   :  { %v249_v38 = vadd.f32 %v248_v35, %v218_v31  ;;  %v315_v39 = vadd.f32 %v314_v62, %v283_v22 }
  0x4b   :  { %251 = vst [vmem:[%s777_s4] sm:$0xff] %v249_v38  ;;  %317 = vst [vmem:[%s778_s5] sm:$0xff] %v315_v39 }

</bundles_post_ra>
